<compile_context>
chip_gen: v5e
topology: v5e:2x2
jax: 0.10.0
libtpu: 0.0.40
codegen_flags: <defaults>
</compile_context>

<pallas_src>
import functools

import jax
import jax.numpy as jnp
from jax.experimental import pallas as pl
from jax.experimental.pallas import tpu as pltpu

_HALO = 128  # one lane-block of halo for the dilated conv taps


def _round_up(a, b):
    return (a + b - 1) // b * b


def _tcn_block_kernel(*refs, kernel_size, dilation, c_out, fused_residual):
    """One (batch, time-tile) step of a TemporalConvBlock.

    refs (fused residual): x_tile, x_halo, w_all, scale, shift, res_b, out
    refs (identity resid): x_tile, x_halo, w_all, scale, shift, out

      x_tile : (C_in, TL)            bf16, time tile (lanes = time)
      x_halo : (C_in, 128)           bf16, next 128 time steps (conv halo)
      w_all  : (C_tot, K*C_in)       bf16, conv taps (+ fused 1x1 residual rows)
      scale  : (C_out, 1)            f32, folded BN scale
      shift  : (C_out, 1)            f32, folded BN shift (conv bias included)
      res_b  : (C_out, 1)            f32, residual conv bias
      out    : (C_out, TL)
    """
    if fused_residual:
        xt_ref, xh_ref, w_ref, scale_ref, shift_ref, resb_ref, out_ref = refs
    else:
        xt_ref, xh_ref, w_ref, scale_ref, shift_ref, out_ref = refs

    tl = out_ref.shape[-1]

    # Current time tile plus its halo -> (C_in, TL + 128), lanes = time.
    xw = jnp.concatenate([xt_ref[...], xh_ref[...]], axis=-1)

    # im2col along sublanes: stack the K dilated taps so the whole dilated conv
    # (and the fused 1x1 residual) is a single MXU matmul, contraction K*C_in.
    taps = [xw[:, k * dilation:k * dilation + tl] for k in range(kernel_size)]
    x_stack = taps[0] if kernel_size == 1 else jnp.concatenate(taps, axis=0)

    acc = jnp.dot(w_ref[...], x_stack, preferred_element_type=jnp.float32)

    # Folded BatchNorm (conv bias already folded into `shift`) + ReLU, in f32.
    # Dropout == identity at inference.
    y = jnp.maximum(acc[:c_out, :] * scale_ref[...] + shift_ref[...], 0.0)

    if fused_residual:
        res = acc[c_out:, :] + resb_ref[...]          # fused 1x1 residual conv
    else:
        # identity residual (C_in == C_out): reuse the centre tap directly.
        res = taps[(kernel_size - 1) // 2].astype(jnp.float32)

    out_ref[...] = (y + res).astype(out_ref.dtype)


def temporal_conv_block(x_ncl, conv_w, conv_b, gamma, beta, run_mean, run_var,
                        res_w=None, res_b=None, *, kernel_size=3, dilation=1,
                        eps=1e-5, block_l=512, out_dtype=jnp.float32,
                        matmul_dtype=jnp.bfloat16):
    """TemporalConvBlock forward (eval mode).

    x_ncl  : (N, C_in, L)       channel-major, time-minor (kernel layout)
    conv_w : (C_out, C_in, K)   PyTorch Conv1d weight
    res_w  : (C_out, C_in, 1) or None (identity residual when C_in == C_out)
    returns: (N, C_out, L) in `out_dtype`
    """
    N, C_in, L = x_ncl.shape
    C_out, c_in_w, K = conv_w.shape
    assert c_in_w == C_in and K == kernel_size
    pad = (kernel_size - 1) * dilation // 2
    assert L + 2 * pad - dilation * (kernel_size - 1) == L, \
        "residual add requires a same-length conv output"
    assert (kernel_size - 1) * dilation <= _HALO, "conv halo exceeds 128 lanes"
    if res_w is None:
        assert C_in == C_out, "identity residual requires C_in == C_out"

    # Time tile: multiple of 128, no larger than the (rounded-up) sequence.
    tl = max(128, min(_round_up(block_l, 128), _round_up(L, 128)))
    l_t = _round_up(L, tl)
    n_tiles = l_t // tl
    tl_blocks = tl // _HALO

    # One zero-pad of the time axis: `pad` on the left (conv 'same' padding),
    # and right padding covering conv pad + round-up slack + the halo block.
    x_pad = jnp.pad(x_ncl.astype(matmul_dtype),
                    ((0, 0), (0, 0), (pad, (l_t - L) + _HALO - pad)))
    # x_pad: (N, C_in, l_t + _HALO)

    # Fold the conv bias into the BatchNorm affine (eval mode).
    scale = gamma.astype(jnp.float32) / jnp.sqrt(run_var.astype(jnp.float32) + eps)
    shift = (beta.astype(jnp.float32) - run_mean.astype(jnp.float32) * scale
             + conv_b.astype(jnp.float32) * scale)

    # Weight matrix: rows = output channels (conv, then fused residual),
    # columns = (tap k, input channel c) flattened as k*C_in + c.
    w_taps = jnp.transpose(conv_w, (2, 0, 1)).astype(jnp.float32)  # (K, C_out, C_in)
    fused_residual = res_w is not None
    if fused_residual:
        k_c = (kernel_size - 1) // 2
        res_rows = jnp.zeros((kernel_size, C_out, C_in), jnp.float32)
        res_rows = res_rows.at[k_c].set(jnp.asarray(res_w)[:, :, 0].astype(jnp.float32))
        w_taps = jnp.concatenate([w_taps, res_rows], axis=1)        # (K, 2*C_out, C_in)
    c_tot = w_taps.shape[1]
    w_all = jnp.transpose(w_taps, (1, 0, 2)).reshape(c_tot, kernel_size * C_in)
    w_all = w_all.astype(matmul_dtype)

    inputs = [x_pad, x_pad, w_all, scale.reshape(C_out, 1), shift.reshape(C_out, 1)]
    in_specs = [
        pl.BlockSpec((None, C_in, tl), lambda n, j: (n, 0, j)),                    # time tile
        pl.BlockSpec((None, C_in, _HALO), lambda n, j: (n, 0, (j + 1) * tl_blocks)),  # halo
        pl.BlockSpec((c_tot, kernel_size * C_in), lambda n, j: (0, 0)),            # weights
        pl.BlockSpec((C_out, 1), lambda n, j: (0, 0)),                             # bn scale
        pl.BlockSpec((C_out, 1), lambda n, j: (0, 0)),                             # bn shift
    ]
    if fused_residual:
        rb = jnp.zeros((C_out,), jnp.float32) if res_b is None else res_b.astype(jnp.float32)
        inputs.append(rb.reshape(C_out, 1))
        in_specs.append(pl.BlockSpec((C_out, 1), lambda n, j: (0, 0)))

    kernel = functools.partial(_tcn_block_kernel, kernel_size=kernel_size,
                               dilation=dilation, c_out=C_out,
                               fused_residual=fused_residual)

    # Explicit VMEM budget: double-buffered blocks + in-kernel temporaries,
    # clamped so it is valid on v7x (64 MiB physical VMEM).
    esz = jnp.dtype(matmul_dtype).itemsize
    osz = jnp.dtype(out_dtype).itemsize
    need = (2 * C_in * (tl + _HALO) * esz          # x tile + halo (double-buffered)
            + 2 * C_out * tl * osz                 # output tile (double-buffered)
            + c_tot * kernel_size * C_in * esz     # weights
            + kernel_size * C_in * tl * esz        # im2col stack
            + c_tot * tl * 4)                      # f32 accumulator
    vmem_limit = int(min(max(4 * need + (4 << 20), 16 << 20), 48 << 20))

    out = pl.pallas_call(
        kernel,
        out_shape=jax.ShapeDtypeStruct((N, C_out, l_t), out_dtype),
        grid=(N, n_tiles),
        in_specs=in_specs,
        out_specs=pl.BlockSpec((None, C_out, tl), lambda n, j: (n, 0, j)),
        compiler_params=pltpu.CompilerParams(
            dimension_semantics=("parallel", "parallel"),
            vmem_limit_bytes=vmem_limit),
    )(*inputs)

    return out if l_t == L else out[:, :, :L]


def temporal_conv_net(x, block_params, *, kernel_size=3, block_l=512,
                      matmul_dtype=jnp.bfloat16):
    """TemporalConvNet forward (eval mode), matching the PyTorch module.

    x            : (N, L, C_in)  -- the module transposes to (N, C, L) internally
    block_params : list of per-block dicts (conv_w, conv_b, gamma, beta, mean,
                   var, optional res_w / res_b); block i uses dilation 2**i.
    returns      : (N, L, channels[-1]) float32
    """
    h = jnp.transpose(x, (0, 2, 1))            # == x.transpose(1, 2) in PyTorch
    num = len(block_params)
    for i, p in enumerate(block_params):
        out_dtype = jnp.float32 if i == num - 1 else jnp.bfloat16
        h = temporal_conv_block(
            h, p["conv_w"], p["conv_b"], p["gamma"], p["beta"], p["mean"],
            p["var"], p.get("res_w"), p.get("res_b"),
            kernel_size=kernel_size, dilation=2 ** i, block_l=block_l,
            out_dtype=out_dtype, matmul_dtype=matmul_dtype)
    return jnp.transpose(h, (0, 2, 1))         # back to (N, L, C_out)


# ----------------------------- pure-JAX reference -----------------------------

def _bf16(a):
    return a.astype(jnp.bfloat16).astype(jnp.float32)


def _reference_block(x_ncl, conv_w, conv_b, gamma, beta, mean, var,
                     res_w, res_b, *, kernel_size, dilation, eps=1e-5):
    """Eval-mode TemporalConvBlock with the kernel's numerics:
    bf16-rounded matmul operands, f32 accumulation / epilogue."""
    pad = (kernel_size - 1) * dilation // 2
    xr = _bf16(x_ncl.astype(jnp.float32))
    y = jax.lax.conv_general_dilated(
        xr, _bf16(conv_w), window_strides=(1,), padding=[(pad, pad)],
        rhs_dilation=(dilation,), dimension_numbers=("NCH", "OIH", "NCH"))
    scale = gamma / jnp.sqrt(var + eps)
    shift = beta - mean * scale + conv_b * scale
    y = jnp.maximum(y * scale[None, :, None] + shift[None, :, None], 0.0)
    if res_w is None:
        res = xr
    else:
        res = jax.lax.conv_general_dilated(
            xr, _bf16(res_w), window_strides=(1,), padding=[(0, 0)],
            dimension_numbers=("NCH", "OIH", "NCH")) + res_b[None, :, None]
    return y + res


def _reference_net(x, block_params, *, kernel_size=3):
    h = jnp.transpose(x, (0, 2, 1))
    for i, p in enumerate(block_params):
        h = _reference_block(h, p["conv_w"], p["conv_b"], p["gamma"], p["beta"],
                             p["mean"], p["var"], p.get("res_w"), p.get("res_b"),
                             kernel_size=kernel_size, dilation=2 ** i)
    return jnp.transpose(h, (0, 2, 1))


# ------------------------------------ demo ------------------------------------

def _init_block_params(key, c_in, c_out, k):
    ks = jax.random.split(key, 8)
    w_scale = float(c_in * k) ** -0.5
    p = dict(
        conv_w=jax.random.normal(ks[0], (c_out, c_in, k), jnp.float32) * w_scale,
        conv_b=0.1 * jax.random.normal(ks[1], (c_out,), jnp.float32),
        gamma=1.0 + 0.1 * jax.random.normal(ks[2], (c_out,), jnp.float32),
        beta=0.1 * jax.random.normal(ks[3], (c_out,), jnp.float32),
        mean=0.1 * jax.random.normal(ks[4], (c_out,), jnp.float32),
        var=1.0 + 0.5 * jax.random.uniform(ks[5], (c_out,), jnp.float32),
    )
    if c_in != c_out:  # residual is a 1x1 Conv1d, else nn.Identity
        p["res_w"] = jax.random.normal(ks[6], (c_out, c_in, 1), jnp.float32) * float(c_in) ** -0.5
        p["res_b"] = 0.1 * jax.random.normal(ks[7], (c_out,), jnp.float32)
    return p


if __name__ == "__main__":
    N, L, C_IN = 2, 256, 16
    CHANNELS = (32, 32, 16)       # block i uses dilation 2**i -> 1, 2, 4
    K = 3

    key = jax.random.PRNGKey(0)
    kx, kp = jax.random.split(key)
    x = jax.random.normal(kx, (N, L, C_IN), jnp.float32)

    params = []
    c_in = C_IN
    for c_out, bk in zip(CHANNELS, jax.random.split(kp, len(CHANNELS))):
        params.append(_init_block_params(bk, c_in, c_out, K))
        c_in = c_out

    out = temporal_conv_net(x, params, kernel_size=K, block_l=128)
    out = jax.block_until_ready(out)

    ref = _reference_net(x, params, kernel_size=K)
    assert out.shape == (N, L, CHANNELS[-1]), out.shape
    max_err = float(jnp.max(jnp.abs(out - ref)))
    assert jnp.allclose(out, ref, atol=3e-2, rtol=3e-2), f"max abs diff {max_err}"

    print("KERNEL_OK")
</pallas_src>

<mosaic_0001>
module attributes {stable_mosaic.version = 11 : i64} {
  func.func @_tcn_block_kernel(%arg0: i32, %arg1: i32, %arg2: memref<1x16x128xbf16, #tpu.memory_space<vmem>>, %arg3: memref<1x16x128xbf16, #tpu.memory_space<vmem>>, %arg4: memref<64x48xbf16, #tpu.memory_space<vmem>>, %arg5: memref<32x1xf32, #tpu.memory_space<vmem>>, %arg6: memref<32x1xf32, #tpu.memory_space<vmem>>, %arg7: memref<32x1xf32, #tpu.memory_space<vmem>>, %arg8: memref<1x32x128xbf16, #tpu.memory_space<vmem>>) attributes {dimension_semantics = [#tpu.dimension_semantics<parallel>, #tpu.dimension_semantics<parallel>], iteration_bounds = array<i64: 2, 2>, scalar_prefetch = 0 : i64, scratch_operands = 0 : i64, tpu.core_type = #tpu.core_type<tc>, window_params = [{transform_indices = @transform_0, window_bounds = array<i64: 1, 16, 128>}, {transform_indices = @transform_1, window_bounds = array<i64: 1, 16, 128>}, {pipeline_mode = #tpu.pipeline_mode<synchronous>, transform_indices = @transform_2, window_bounds = array<i64: 64, 48>}, {pipeline_mode = #tpu.pipeline_mode<synchronous>, transform_indices = @transform_3, window_bounds = array<i64: 32, 1>}, {pipeline_mode = #tpu.pipeline_mode<synchronous>, transform_indices = @transform_4, window_bounds = array<i64: 32, 1>}, {pipeline_mode = #tpu.pipeline_mode<synchronous>, transform_indices = @transform_5, window_bounds = array<i64: 32, 1>}, {transform_indices = @transform_6, window_bounds = array<i64: 1, 32, 128>}]} {
    %c0 = arith.constant 0 : index
    %c0_0 = arith.constant 0 : index
    %c0_1 = arith.constant 0 : index
    %0 = vector.load %arg2[%c0, %c0_0, %c0_1] : memref<1x16x128xbf16, #tpu.memory_space<vmem>>, vector<1x16x128xbf16>
    %1 = vector.shape_cast %0 : vector<1x16x128xbf16> to vector<16x128xbf16>
    %c0_2 = arith.constant 0 : index
    %c0_3 = arith.constant 0 : index
    %c0_4 = arith.constant 0 : index
    %2 = vector.load %arg3[%c0_2, %c0_3, %c0_4] : memref<1x16x128xbf16, #tpu.memory_space<vmem>>, vector<1x16x128xbf16>
    %3 = vector.shape_cast %2 : vector<1x16x128xbf16> to vector<16x128xbf16>
    %4 = tpu.concatenate %1, %3 in 1 : vector<16x128xbf16>, vector<16x128xbf16> -> vector<16x256xbf16>
    %5 = vector.extract_strided_slice %4 {offsets = [0, 0], sizes = [16, 128], strides = [1, 1]} : vector<16x256xbf16> to vector<16x128xbf16>
    %6 = vector.extract_strided_slice %4 {offsets = [0, 1], sizes = [16, 128], strides = [1, 1]} : vector<16x256xbf16> to vector<16x128xbf16>
    %7 = vector.extract_strided_slice %4 {offsets = [0, 2], sizes = [16, 128], strides = [1, 1]} : vector<16x256xbf16> to vector<16x128xbf16>
    %8 = tpu.concatenate %5, %6, %7 in 0 : vector<16x128xbf16>, vector<16x128xbf16>, vector<16x128xbf16> -> vector<48x128xbf16>
    %c0_5 = arith.constant 0 : index
    %c0_6 = arith.constant 0 : index
    %9 = vector.load %arg4[%c0_5, %c0_6] : memref<64x48xbf16, #tpu.memory_space<vmem>>, vector<64x48xbf16>
    %cst = arith.constant dense<0.000000e+00> : vector<64x128xf32>
    %10 = tpu.matmul %9, %8, %cst {dimension_numbers = #tpu.dot_dimension_numbers<[1], [0], [0], [1], [0, 0, 1, 1], [], []>} : vector<64x48xbf16>, vector<48x128xbf16>, vector<64x128xf32> -> vector<64x128xf32>
    %11 = vector.extract_strided_slice %10 {offsets = [0, 0], sizes = [32, 128], strides = [1, 1]} : vector<64x128xf32> to vector<32x128xf32>
    %c0_7 = arith.constant 0 : index
    %c0_8 = arith.constant 0 : index
    %12 = vector.load %arg5[%c0_7, %c0_8] : memref<32x1xf32, #tpu.memory_space<vmem>>, vector<32x1xf32>
    %13 = vector.broadcast %12 : vector<32x1xf32> to vector<32x128xf32>
    %14 = arith.mulf %11, %13 : vector<32x128xf32>
    %c0_9 = arith.constant 0 : index
    %c0_10 = arith.constant 0 : index
    %15 = vector.load %arg6[%c0_9, %c0_10] : memref<32x1xf32, #tpu.memory_space<vmem>>, vector<32x1xf32>
    %16 = vector.broadcast %15 : vector<32x1xf32> to vector<32x128xf32>
    %17 = arith.addf %14, %16 : vector<32x128xf32>
    %cst_11 = arith.constant 0.000000e+00 : f32
    %18 = vector.broadcast %cst_11 : f32 to vector<32x128xf32>
    %19 = arith.maximumf %17, %18 : vector<32x128xf32>
    %20 = vector.extract_strided_slice %10 {offsets = [32, 0], sizes = [32, 128], strides = [1, 1]} : vector<64x128xf32> to vector<32x128xf32>
    %c0_12 = arith.constant 0 : index
    %c0_13 = arith.constant 0 : index
    %21 = vector.load %arg7[%c0_12, %c0_13] : memref<32x1xf32, #tpu.memory_space<vmem>>, vector<32x1xf32>
    %22 = vector.broadcast %21 : vector<32x1xf32> to vector<32x128xf32>
    %23 = arith.addf %20, %22 : vector<32x128xf32>
    %24 = arith.addf %19, %23 : vector<32x128xf32>
    %25 = arith.truncf %24 : vector<32x128xf32> to vector<32x128xbf16>
    %c0_14 = arith.constant 0 : index
    %c0_15 = arith.constant 0 : index
    %c0_16 = arith.constant 0 : index
    %26 = vector.load %arg8[%c0_14, %c0_15, %c0_16] : memref<1x32x128xbf16, #tpu.memory_space<vmem>>, vector<1x32x128xbf16>
    %27 = vector.shape_cast %26 : vector<1x32x128xbf16> to vector<32x128xbf16>
    %28 = vector.shape_cast %25 : vector<32x128xbf16> to vector<1x32x128xbf16>
    tpu.vector_store %arg8[%c0_14, %c0_15, %c0_16], %28 {strides = array<i32>} : memref<1x32x128xbf16, #tpu.memory_space<vmem>>, vector<1x32x128xbf16>,
    return
  }
  func.func @transform_0(%arg0: i32, %arg1: i32) -> (i32, i32, i32) {
    %c0_i32 = arith.constant 0 : i32
    %c0_i32_0 = arith.constant 0 : i32
    return %arg0, %c0_i32, %arg1 : i32, i32, i32
  }
  func.func @transform_1(%arg0: i32, %arg1: i32) -> (i32, i32, i32) {
    %c1_i32 = arith.constant 1 : i32
    %0 = arith.addi %arg1, %c1_i32 : i32
    %c1_i32_0 = arith.constant 1 : i32
    %1 = arith.muli %0, %c1_i32_0 : i32
    %c0_i32 = arith.constant 0 : i32
    %c0_i32_1 = arith.constant 0 : i32
    return %arg0, %c0_i32, %1 : i32, i32, i32
  }
  func.func @transform_2(%arg0: i32, %arg1: i32) -> (i32, i32) {
    %c0_i32 = arith.constant 0 : i32
    %c0_i32_0 = arith.constant 0 : i32
    %c0_i32_1 = arith.constant 0 : i32
    return %c0_i32, %c0_i32_0 : i32, i32
  }
  func.func @transform_3(%arg0: i32, %arg1: i32) -> (i32, i32) {
    %c0_i32 = arith.constant 0 : i32
    %c0_i32_0 = arith.constant 0 : i32
    %c0_i32_1 = arith.constant 0 : i32
    return %c0_i32, %c0_i32_0 : i32, i32
  }
  func.func @transform_4(%arg0: i32, %arg1: i32) -> (i32, i32) {
    %c0_i32 = arith.constant 0 : i32
    %c0_i32_0 = arith.constant 0 : i32
    %c0_i32_1 = arith.constant 0 : i32
    return %c0_i32, %c0_i32_0 : i32, i32
  }
  func.func @transform_5(%arg0: i32, %arg1: i32) -> (i32, i32) {
    %c0_i32 = arith.constant 0 : i32
    %c0_i32_0 = arith.constant 0 : i32
    %c0_i32_1 = arith.constant 0 : i32
    return %c0_i32, %c0_i32_0 : i32, i32
  }
  func.func @transform_6(%arg0: i32, %arg1: i32) -> (i32, i32, i32) {
    %c0_i32 = arith.constant 0 : i32
    %c0_i32_0 = arith.constant 0 : i32
    return %arg0, %c0_i32, %arg1 : i32, i32, i32
  }
}

</mosaic_0001>

<bundles_post_ra>
// kernel: tpu_custom_call.1
= control target key start
LH: loop header
LB: loop body
LE: loop exit
PB: predicated region body
PF: predicated region fallthrough
CT: control target
= control target key end

     0   :  { %s1262_s0 = inlined_call_operand.vmem [shape: bf16[2,16,384], index: 0, kind: input, shape index: {}]   ;;  %s1263_s1 = inlined_call_operand.vmem [shape: bf16[2,16,384], index: 1, kind: input, shape index: {}]   ;;  %s1264_s2 = inlined_call_operand.vmem [shape: bf16[64,48], index: 2, kind: input, shape index: {}]   ;;  %s1265_s3 = inlined_call_operand.vmem [shape: f32[32,1], index: 3, kind: input, shape index: {}]   ;;  %s1266_s4 = inlined_call_operand.vmem [shape: f32[32,1], index: 4, kind: input, shape index: {}]   ;;  %s1267_s5 = inlined_call_operand.vmem [shape: f32[32,1], index: 5, kind: input, shape index: {}]   ;;  %s1268_s6 = inlined_call_operand.hbm [shape: bf16[2,32,256], index: 6, kind: output, shape index: {}]  }
   0x1   :  { %1273 = sst [smem:[#allocation11_spill]] %s1268_s6 }
   0x2   :  { %11 = vsyncpa [#allocation5], 0 }
   0x3   :  { %13 = vsyncpa [#allocation5 + $0x1], 0  ;;  %s1034_s21 = smov 0   ;;  %s1036_s22 = smov 0  }
   0x4   :  { %s1038_s23 = smov 0   ;;  %s1040_s24 = smov 0  }
   0x5   :  { %s1042_s25 = smov 0   ;;  %s1044_s26 = smov 0  }
   0x6   :  { %s1046_s27 = smov 0   ;;  %s1048_s28 = smov 0  }
   0x7   :  { %s1050_s29 = smov 0   ;;  %s1052_s30 = smov 0  }
   0x8 LB: > { %1274 = sst [smem:[#allocation7_spill]] %s971_s25  ;;  %s711_s7 = sadd.s32 4294967295, %s991_s30   ;;  %s991_s30 = sphi %s1052_s30, %s19_s30   ;;  %s987_s29 = sphi %s1050_s29, %s1294_s29   ;;  %s983_s28 = sphi %s1048_s28, %s1293_s28   ;;  %s979_s27 = sphi %s1046_s27, %s1292_s27   ;;  %s975_s26 = sphi %s1044_s26, %s1291_s26   ;;  %s971_s25 = sphi %s1042_s25, %s1284_s25   ;;  %s967_s24 = sphi %s1040_s24, %s1290_s24   ;;  %s963_s23 = sphi %s1038_s23, %s1289_s23   ;;  %s959_s22 = sphi %s1036_s22, %s1288_s22   ;;  %s955_s21 = sphi %s1034_s21, %s1287_s21  }
   0x9   : > { %s712_s8 = sadd.s32 4294967294, %s991_s30   ;;  %s28_s9 = sadd.s32 1, %s983_s28 }
   0xa   : > { %s31_s10 = sadd.s32 1, %s987_s29  ;;  %p29_p0 = scmp.ge.s32.totalorder %s28_s9, 2 }
   0xb   : > { %s40_s11 = sadd.s32 1, %s971_s25  ;;  %p47_p1 = scmp.ne.s32.totalorder %s971_s25, %s967_s24 }
   0xc   : > { %p48_p2 = scmp.eq.s32.totalorder %s991_s30, 0  ;;  %s1296_s10 = smov (!%p29_p0, %s31_s10), %s987_s29 }
   0xd   : > { %s1092_s12 = scalar_select %p29_p0, 0, %s28_s9  }
   0xe   : > { %p1102_p3 = por %p48_p2, %p47_p1  ;;  %p33_p4 = scmp.ge.s32.totalorder %s1296_s10, 2 }
   0xf   : > { %1275 = sst [smem:[#allocation8_spill]] %s1092_s12  ;;  %s36_s13 = ssub.s32 %s983_s28, %s1092_s12 }
  0x10   : > { %s64_s15 = sadd.s32 1, %s1092_s12  ;;  %s70_s17 = sadd.s32 1, %s963_s23 }
  0x11   : > { %s66_s16 = ssub.s32 %s28_s9, %s64_s15  ;;  %s1298_s10 = smov (%p33_p4, %s1296_s10), 0 }
  0x12   : > { %1277 = sst [smem:[#allocation9_spill]] %s1298_s10  ;;  %p77_p5 = scmp.ne.s32.totalorder %s963_s23, %s959_s22 }
  0x13   : > { %p193_p6 = scmp.eq.s32.totalorder %s711_s7, 3  ;;  %s35_s18 = ssub.s32 %s987_s29, %s1298_s10 }
  0x14   : > { %p198_p7 = scmp.ne.s32.totalorder %s967_s24, %s955_s21  ;;  %s37_s19 = sor.u32 %s36_s13, %s35_s18 }
  0x15   : > { %s67_s20 = sor.u32 %s66_s16, %s35_s18  ;;  %p38_p8 = scmp.eq.s32.totalorder %s37_s19, 0 }
  0x16   : > { %p68_p9 = scmp.eq.s32.totalorder %s67_s20, 0  ;;  %p1118_p10 = por %p77_p5, %p48_p2 }
  0x17   : > { %p1125_p11 = por %p193_p6, %p47_p1  ;;  %p199_p12 = scmp.eq.s32.totalorder %s712_s8, 3 }
  0x18   : > { %s1130_s15 = scalar_select %p38_p8, %s971_s25, %s40_s11  }
  0x19   : > { %s1133_s12 = scalar_select %p68_p9, %s963_s23, %s70_s17  }
  0x1a   : > { %1280 = sst [smem:[#allocation10_spill]] %s1130_s15  ;;  %p1135_p13 = por %p199_p12, %p198_p7 }
  0x1b   : > { %p714_p0 = scmp.ge.s32.totalorder %s991_s30, 4 }
  0x1d   : > { %227 = sbr.rel (%p714_p0) target bundleno = 52 (0x34), region = 32 }
  0x22   : > { %230 = sbr.rel (!%p1102_p3) target bundleno = 43 (0x2b), region = 36  ;;  %s232_s13 = sand.u32 (%p1102_p3), 1, %s971_s25  }
  0x23   : > { %s784_s16 = smul.u32 (%p1102_p3), 6, %s987_s29  ;;  %s715_s11 = sshll.u32 (%p1102_p3), %s232_s13, 3 }
  0x24   : > { %s234_s10 = scalar_lea.vmem (%p1102_p3), [#allocation2], %s715_s11 }
  0x25   : > { %s236_s18 = sadd.s32 (%p1102_p3), %s983_s28, %s784_s16 }
  0x26   : > { %s716_s17 = sshll.u32 (%p1102_p3), %s236_s18, 2 }
  0x27   : > { %s238_s20 = scalar_lea.vmem %s1262_s0, %s716_s17 }
  0x28   : > { %v255_v0 = vld [vmem:[%s238_s20] sm:$0xf]  ;;  %v257_v1 = vld [vmem:[%s238_s20 + $0xc] sm:$0xf] }
  0x29   : > { %256 = vst [vmem:[%s234_s10] sm:$0xf] %v255_v0 }
  0x2a   : > { %258 = vst [vmem:[%s234_s10 + $0x4] sm:$0xf] %v257_v1 }
  0x2b PF: > { %286 = sbr.rel (!%p1118_p10) target bundleno = 52 (0x34), region = 77  ;;  %s288_s14 = sand.u32 (%p1118_p10), 1, %s963_s23  }
  0x2c   : > { %s639_s13 = smul.u32 (%p1118_p10), 6, %s987_s29  ;;  %s717_s16 = sshll.u32 (%p1118_p10), %s288_s14, 3 }
  0x2d   : > { %s290_s11 = scalar_lea.vmem (%p1118_p10), [#allocation3], %s717_s16 }
  0x2e   : > { %s640_s18 = sadd.s32 (%p1118_p10), %s983_s28, %s639_s13 }
  0x2f   : > { %s718_s15 = sshll.u32 (%p1118_p10), %s640_s18, 2 }
  0x30   : > { %s642_s17 = scalar_lea.vmem %s1263_s1, %s718_s15 }
  0x31   : > { %v719_v2 = vld [vmem:[%s642_s17 + $0x4] sm:$0xf]  ;;  %v720_v3 = vld [vmem:[%s642_s17 + $0x10] sm:$0xf] }
  0x32   : > { %313 = vst [vmem:[%s290_s11] sm:$0xf] %v719_v2 }
  0x33   : > { %315 = vst [vmem:[%s290_s11 + $0x4] sm:$0xf] %v720_v3 }
  0x34 PF: > { %p721_p1 = scmp.ge.s32.totalorder %s991_s30, 1  ;;  %p342_p2 = scmp.lt.s32.totalorder %s991_s30, 5 }
  0x36   : > { %p343_p3 = pnand %p721_p1, %p342_p2 }
  0x37   : > { %s1159_s6 = sand.u32 (!%p343_p3), 1, %s967_s24   ;;  %s356_s10 = sand.u32 (!%p343_p3), 1, %s959_s22  }
  0x38   : > { %346 = sbr.rel (%p343_p3) target bundleno = 352 (0x160), region = 118  ;;  %s722_s25 = sshll.u32 (!%p343_p3), %s1159_s6, 3 }
  0x39   : > { %s351_s15 = scalar_lea.vmem (!%p343_p3), [#allocation2], %s722_s25  ;;  %s723_s8 = sshll.u32 (!%p343_p3), %s356_s10, 3 }
  0x3a   : > { %s994_s20 = smov (!%p343_p3), 127   ;;  %s995_s14 = smov (!%p343_p3), 126  }
  0x3b   : > { %s358_s13 = scalar_lea.vmem (!%p343_p3), [#allocation3], %s723_s8  ;;  %s754_s25 = sshll.u32 (!%p343_p3), %s979_s27, 3 }
  0x3c   : > { %s601_s10 = sadd.s32 (!%p343_p3), %s975_s26, %s754_s25  ;;  %s591_s19 = scalar_lea.sflag (!%p343_p3), [#allocation5], %s1159_s6 }
  0x3d   : > { %v993_v4 = vmov 0   ;;  %v758_v5 = vld [vmem:[%s351_s15] sm:$0xff]  ;;  %v759_v6 = vld [vmem:[%s358_s13] sm:$0xff]  ;;  %vm417_vm0 = vcmask 1031168   ;;  %vm410_vm1 = vcmask 1039360   ;;  %vm448_vm2 = vcmask 392192  }
  0x3e   : > { %880 = vset.pattern.permute.xlu1 %v993_v4  ;;  %878 = vset.pattern.permute.xlu2 %v993_v4  ;;  %v493_v7 = vld [vmem:[%s1265_s3 + $0x18] sm:$0xff]  ;;  %v490_v8 = vld [vmem:[%s1265_s3] sm:$0xff]  ;;  %v519_v9 = vld [vmem:[%s1266_s4 + $0x8] sm:$0xff]  ;;  %s724_s15 = sshll.u32 %s1159_s6, 4  ;;  %s755_s8 = sshll.u32 %s601_s10, 2 }
  0x3f   : > { %879 = vset.pattern.permute.xlu0 %v993_v4  ;;  %406 = vrot.lane.b32.xlu1 %v758_v5, %s994_s20  ;;  %v491_v10 = vld [vmem:[%s1265_s3 + $0x8] sm:$0xff]  ;;  %v550_v11 = vld [vmem:[%s1267_s5] sm:$0xff]  ;;  %v492_v12 = vld [vmem:[%s1265_s3 + $0x10] sm:$0xff]  ;;  %s388_s26 = scalar_lea.vmem [#allocation4], %s724_s15 }
  0x40   : > { %413 = vrot.lane.b32.xlu0 %v758_v5, %s995_s14  ;;  %496 = vperm.xlu2 %878, %v490_v8   ;;  %v518_v13 = vld [vmem:[%s1266_s4] sm:$0xff]  ;;  %v553_v14 = vld [vmem:[%s1267_s5 + $0x18] sm:$0xff]  ;;  %v520_v16 = vld [vmem:[%s1266_s4 + $0x10] sm:$0xff]  ;;  %s604_s16 = sshll.u32 %s388_s26, 4  ;;  %s605_s16 = int_to_ptr.vmem [resolvable:$true] %s604_s16 }
  0x41   : > { %v521_v15 = vld [vmem:[%s1266_s4 + $0x18] sm:$0xff]  ;;  %v552_v17 = vld [vmem:[%s1267_s5 + $0x10] sm:$0xff]  ;;  %v551_v20 = vld [vmem:[%s1267_s5 + $0x8] sm:$0xff] }
  0x42   : > { %v760_v25 = vld [vmem:[%s1264_s2] sm:$0xff]  ;;  %v761_v26 = vld [vmem:[%s1264_s2 + $0x8] sm:$0xff]  ;;  %v762_v27 = vld [vmem:[%s1264_s2 + $0x10] sm:$0xff] }
  0x43   : > { %v763_v28 = vld [vmem:[%s1264_s2 + $0x18] sm:$0xff] }
  0x47   : > { %408 = vrot.lane.b32.xlu1 %v759_v6, %s994_s20 }
  0x48   : > { %415 = vrot.lane.b32.xlu0 %v759_v6, %s995_s14  ;;  %501 = vperm.xlu2 %878, %v491_v10   ;;  %s1282_s14 = sld [smem:[#allocation11_spill]] }
  0x4e   : > { %s603_s13 = scalar_lea.hbm %s1282_s14, %s755_s8  ;;  %s901_s10 = scalar_lea.hbm %s1282_s14, 64 }
  0x4f   : > { %511 = vperm.xlu1 %880, %v493_v7   ;;  %s606_s18 = sshll.u32 %s603_s13, 4  ;;  %s607_s18 = int_to_ptr.hbm [resolvable:$true] %s606_s18 }
  0x50   : > { %506 = vperm.xlu0 %879, %v492_v12   ;;  %524 = vperm.xlu2 %878, %v518_v13   ;;  %s895_s17 = sshra.s32 %s607_s18, 4  ;;  %s896_s17 = int_to_ptr.hbm [resolvable:$true] %s895_s17 }
  0x51   : > { %s897_s22 = scalar_lea.hbm %s896_s17, 16  ;;  %p902_p7 = scmp.lt.s32.totalorder %s896_s17, %s1282_s14 }
  0x52   : > { %p898_p4 = scmp.ne.s32.totalorder %s896_s17, %s897_s22  ;;  %p903_p8 = scmp.lt.s32.totalorder %s901_s10, %s897_s22 }
  0x54   : > { %p899_p5 = pnand %p898_p4, %p1125_p11  ;;  %p904_p9 = por %p903_p8, %p902_p7 }
  0x56   : > { %p900_p6 = pneg %p899_p5 }
  0x57   : > { %529 = vperm.xlu1 %880, %v519_v9  }
  0x58   : > { %539 = vperm.xlu0 %879, %v521_v15   ;;  %534 = vperm.xlu2 %878, %v520_v16   ;;  %p905_p10 = pnand %p904_p9, %p900_p6 }
  0x5f   : > { %556 = vperm.xlu1 %880, %v550_v11  }
  0x60   : > { %566 = vperm.xlu0 %879, %v552_v17   ;;  %561 = vperm.xlu2 %878, %v551_v20  }
  0x67   : > { %571 = vperm.xlu1 %880, %v553_v14  }
  0x9a   : > { %v497_v29 = vpop.permute.xlu2 %496 }
  0xa2   : > { %v502_v30 = vpop.permute.xlu2 %501 }
  0xaa   : > { %v525_v33 = vpop.permute.xlu2 %524 }
  0xb1   : > { %v407_v18 = vpop.permute.xlu1 %406 }
  0xb2   : > { %v414_v19 = vpop.permute.xlu0 %413  ;;  %v535_v38 = vpop.permute.xlu2 %534 }
  0xb9   : > { %v409_v23 = vpop.permute.xlu1 %408 }
  0xba   : > { %v416_v21 = vpop.permute.xlu0 %415  ;;  %v411_v24 = vsel %vm410_vm1, %v407_v18, %v409_v23  ;;  %v562_v53 = vpop.permute.xlu2 %561 }
  0xbb   : > { %v418_v22 = vsel %vm417_vm0, %v414_v19, %v416_v21 }
  0xbc   : > { %466 = vmatpush.bf16.msra.mxu0 %v418_v22  ;;  %775 = vmatpush.bf16.msra.mxu1 %v418_v22 }
  0xbd   : > { %776 = vmatpush.bf16.msra.mxu2 %v418_v22  ;;  %777 = vmatpush.bf16.msra.mxu3 %v418_v22 }
  0xc0   : > { %467 = vmatpush.bf16.msra.mxu0 %v411_v24  ;;  %778 = vmatpush.bf16.msra.mxu1 %v411_v24 }
  0xc1   : > { %779 = vmatpush.bf16.msra.mxu2 %v411_v24  ;;  %780 = vmatpush.bf16.msra.mxu3 %v411_v24  ;;  %v512_v31 = vpop.permute.xlu1 %511 }
  0xc2   : > { %v507_v32 = vpop.permute.xlu0 %506 }
  0xc4   : > { %468 = vmatpush.bf16.msra.mxu0 %v758_v5  ;;  %781 = vmatpush.bf16.msra.mxu1 %v758_v5 }
  0xc5   : > { %782 = vmatpush.bf16.msra.mxu2 %v758_v5  ;;  %783 = vmatpush.bf16.msra.mxu3 %v758_v5 }
  0xc7   : > { %749 = vmatmul.msk.bf16.vlgmr.msra.gmra.mxu0 %vm448_vm2, %v760_v25  ;;  %750 = vmatmul.msk.bf16.vlgmr.msra.gmra.mxu1 %vm448_vm2, %v761_v26 }
  0xc8   : > { %751 = vmatmul.msk.bf16.vlgmr.msra.gmra.mxu2 %vm448_vm2, %v762_v27  ;;  %752 = vmatmul.msk.bf16.vlgmr.msra.gmra.mxu3 %vm448_vm2, %v763_v28 }
  0xc9   : > { %v530_v34 = vpop.permute.xlu1 %529 }
  0xca   : > { %v540_v37 = vpop.permute.xlu0 %539 }
  0xd1   : > { %v557_v39 = vpop.permute.xlu1 %556 }
  0xd2   : > { %v567_v52 = vpop.permute.xlu0 %566 }
  0xd9   : > { %v572_v54 = vpop.permute.xlu1 %571 }
 0x144   : > { %v470_v35 = vpop.f32.mrf.mxu0  ;;  %v475_v36 = vpop.f32.mrf.mxu1 }
 0x145   : > { %v514_v40 = vmul.f32 %v497_v29, %v470_v35  ;;  %v516_v41 = vmul.f32 %v507_v32, %v475_v36 }
 0x147   : > { %v542_v48 = vadd.f32 %v525_v33, %v514_v40  ;;  %v544_v49 = vadd.f32 %v535_v38, %v516_v41 }
 0x149   : > { %v546_v57 = vmax.f32 %v542_v48, 0.0  ;;  %v548_v58 = vmax.f32 %v544_v49, 0.0 }
 0x14b   : > { %v480_v42 = vpop.f32.mrf.mxu2  ;;  %v485_v43 = vpop.f32.mrf.mxu3 }
 0x14c   : > { %v472_v44 = vpop.f32.mrf.mxu0  ;;  %v477_v45 = vpop.f32.mrf.mxu1  ;;  %v574_v55 = vadd.f32 %v557_v39, %v480_v42  ;;  %v576_v56 = vadd.f32 %v567_v52, %v485_v43 }
 0x14d   : > { %v515_v46 = vmul.f32 %v502_v30, %v472_v44  ;;  %v517_v47 = vmul.f32 %v512_v31, %v477_v45 }
 0x14e   : > { %v578_v1 = vadd.f32 %v574_v55, %v546_v57  ;;  %v580_v2 = vadd.f32 %v576_v56, %v548_v58 }
 0x14f   : > { %v543_v50 = vadd.f32 %v530_v34, %v515_v46  ;;  %v545_v51 = vadd.f32 %v540_v37, %v517_v47 }
 0x151   : > { %v547_v61 = vmax.f32 %v543_v50, 0.0  ;;  %v549_v62 = vmax.f32 %v545_v51, 0.0 }
 0x153   : > { %v482_v59 = vpop.f32.mrf.mxu2  ;;  %v487_v60 = vpop.f32.mrf.mxu3 }
 0x154   : > { %v575_v63 = vadd.f32 %v562_v53, %v482_v59  ;;  %v577_v0 = vadd.f32 %v572_v54, %v487_v60 }
 0x156   : > { %v579_v3 = vadd.f32 %v575_v63, %v547_v61  ;;  %v581_v4 = vadd.f32 %v577_v0, %v549_v62 }
 0x158   : > { %v767_v5 = vpack.c.bf16 %v579_v3, %v578_v1  ;;  %v772_v6 = vpack.c.bf16 %v581_v4, %v580_v2 }
 0x15a   : > { %768 = vst [vmem:[%s388_s26] sm:$0xff] %v767_v5  }
 0x15b   : > { %774 = vst [vmem:[%s388_s26 + $0x8] sm:$0xff] %v772_v6  }
 0x15c   : > { %908 = shalt.err (!%p905_p10)
}
 0x15d   : > { %s996_s6 = smov 64   ;;  %s997_s27 = smov 128  }
 0x15e   : > { %s998_s20 = smov 4  }
 0x15f   : > { %785 = dma.vmem_to_hbm [thread:$0]  (%p1125_p11), %s605_s16, 256, %s607_s18, %s591_s19, %s996_s6, %s997_s27, %s998_s20  }
 0x160 PF: > { %p791_p12 = scmp.ge.s32.totalorder %s991_s30, 2  ;;  %s621_s13 = sand.u32 1, %s955_s21  }
 0x161   : > { %s622_s26 = scalar_lea.sflag [#allocation5], %s621_s13 }
 0x162   : > { %p788_p0 = pnand %p791_p12, %p1135_p13 }
 0x164   : > { %p789_p1 = pneg %p788_p0 }
 0x166   : > { %950 = dma.done.wait (%p789_p1), %s622_s26, 256  }
 0x167   : > { %952 = vsyncadd (%p789_p1), %s622_s26, 4294967040  ;;  %s19_s30 = sadd.s32 1, %s991_s30   ;;  %s1283_s9 = sld [smem:[#allocation7_spill]] }
 0x168   : > { %p16_p2 = scmp.ge.s32.totalorder %s19_s30, 6   ;;  %s1284_s25 = sld [smem:[#allocation10_spill]] }
 0x169   : > { %s1285_s16 = sld [smem:[#allocation8_spill]]  ;;  %s1287_s21 = smov %s967_s24 }
 0x16a   : > { %s1286_s18 = sld [smem:[#allocation9_spill]]  ;;  %s1288_s22 = smov %s963_s23 }
 0x16b   : > { %s1289_s23 = smov %s1133_s12  ;;  %s1291_s26 = smov %s983_s28 }
 0x16c   : > { %s1292_s27 = smov %s987_s29  ;;  %18 = sbr.rel (!%p16_p2) target bundleno = 8 (0x8), region = 174 }
 0x16d   : > { %s1290_s24 = smov %s1283_s9 }
 0x16f   : > { %s1293_s28 = smov %s1285_s16 }
 0x170   : > { %s1294_s29 = smov %s1286_s18 }
 0x171   :  { %628 = vsyncpa [#allocation5], 1 }
 0x172   :  { %630 = vsyncpa [#allocation5 + $0x1], 1 }

</bundles_post_ra>
